<compile_context>
chip_gen: v6e
topology: v6e:2x2x1
jax: 0.10.0
libtpu: 0.0.40
codegen_flags: <defaults>
</compile_context>

<pallas_src>
import functools

import jax
import jax.numpy as jnp
from jax.experimental import pallas as pl
from jax.experimental.pallas import tpu as pltpu


def _round_up(n, m):
    return (n + m - 1) // m * m


def _cdiv(a, b):
    return (a + b - 1) // b


def _vmem_capacity_bytes():
    """Physical VMEM per TensorCore; conservative fallback if query fails."""
    try:
        info = pltpu.get_tpu_info()
        cap = int(getattr(info, "vmem_capacity_bytes", 0) or 0)
        if cap > 0:
            return cap
    except Exception:
        pass
    return 64 * 1024 * 1024  # v7x-safe fallback


def _pick_tile_hw(hw, c, itemsize, vmem_cap):
    """Lane-dense HW tile for the streaming (two-pass) path.

    Multiple of 128, floor 512 lanes (amortizes per-step overhead / keeps DMA
    row chunks big), capped by a per-buffer VMEM budget that scales with the
    chip's VMEM (smaller on v7x), and never larger than round_up(HW, 128).
    """
    hw128 = _round_up(hw, 128)
    per_buffer = max(2 * 1024 * 1024, min(16 * 1024 * 1024, vmem_cap // 10))
    by_budget = (per_buffer // max(1, c * itemsize)) // 128 * 128
    max_lanes = 4096 if vmem_cap >= 96 * 1024 * 1024 else 2048
    # NOTE: for extremely large C the 512-lane floor could exceed the budget;
    # such cases would additionally need C tiling.
    tile = min(max_lanes, max(512, by_budget))
    tile = min(tile, hw128)
    return int(max(tile, 128))


# --------------------------------------------------------------------------
# Fused single-pass kernel: pool -> MLP -> scale on one (1, C, HW) slab.
# --------------------------------------------------------------------------
def fused_se_kernel(x_ref, w1_ref, b1_ref, w2_ref, b2_ref, o_ref, *, inv_hw):
    x = x_ref[...]                                             # (1, C, HW)
    # Squeeze: global average pool over the spatial (lane) axis, f32 accum.
    y = jnp.sum(x.astype(jnp.float32), axis=-1) * inv_hw       # (1, C)
    # Excite: tiny Linear -> ReLU -> Linear -> Sigmoid (negligible FLOPs).
    h = jnp.dot(y, w1_ref[...].astype(jnp.float32),
                preferred_element_type=jnp.float32) + b1_ref[...].astype(jnp.float32)
    h = jnp.maximum(h, 0.0)
    z = jnp.dot(h, w2_ref[...].astype(jnp.float32),
                preferred_element_type=jnp.float32) + b2_ref[...].astype(jnp.float32)
    s = jax.nn.sigmoid(z)                                      # (1, C) f32
    # Scale: cast once to x's dtype so the hot multiply stays narrow.
    scale = s.astype(x.dtype)[:, :, None]                      # (1, C, 1)
    o_ref[...] = (x * scale).astype(o_ref.dtype)


# --------------------------------------------------------------------------
# Two-pass fallback, pass 1: spatial-sum with a lane-strip accumulator.
# --------------------------------------------------------------------------
def pool_sum_kernel(x_ref, ssum_ref, acc_ref, *, hw, tile_hw):
    """x_ref: (1, C, tile_hw); ssum_ref: (1, C, 1) resident per-b output;
    acc_ref: (1, C, 128) f32 lane-strip accumulator (VMEM scratch)."""
    k = pl.program_id(1)
    last = pl.num_programs(1) - 1

    @pl.when(k == 0)
    def _():
        acc_ref[...] = jnp.zeros_like(acc_ref)

    x = x_ref[...].astype(jnp.float32)                         # (1, C, tile_hw)

    def accumulate(xv):
        # Lane-strip adds (VPU); no per-tile cross-lane reduce.
        acc = acc_ref[...]
        for i in range(tile_hw // 128):
            acc = acc + xv[:, :, i * 128:(i + 1) * 128]
        acc_ref[...] = acc

    if hw % tile_hw != 0:
        # Ragged last tile: Pallas edge-block padding is NOT guaranteed to be
        # zero, so mask out-of-range lanes before summing (only on the last
        # tile; full tiles stay on the unmasked hot path).
        @pl.when(k != last)
        def _():
            accumulate(x)

        @pl.when(k == last)
        def _():
            lane = jax.lax.broadcasted_iota(jnp.int32, x.shape, dimension=2)
            accumulate(jnp.where(lane + k * tile_hw < hw, x, 0.0))
    else:
        accumulate(x)

    @pl.when(k == last)
    def _():
        # Single cross-lane reduce per b; keeps C in the sublane layout.
        ssum_ref[...] = jnp.sum(acc_ref[...], axis=-1, keepdims=True)


# --------------------------------------------------------------------------
# Two-pass fallback, pass 2: streaming broadcast-multiply.
# --------------------------------------------------------------------------
def scale_kernel(x_ref, s_ref, o_ref):
    """x_ref/o_ref: (1, C, tile_hw); s_ref: (1, C, 1), already in x's dtype."""
    o_ref[...] = (x_ref[...] * s_ref[...]).astype(o_ref.dtype)


# --------------------------------------------------------------------------
# Wrapper
# --------------------------------------------------------------------------
def se_block(x_nchw, w1, b1, w2, b2, *, tile_hw=None, force_two_pass=False):
    """x_nchw: (B, C, H, W). w1: (C, C//r), b1: (1, C//r), w2: (C//r, C), b2: (1, C)."""
    B, C, H, W = x_nchw.shape
    HW = H * W
    x_flat = x_nchw.reshape(B, C, HW)
    itemsize = x_flat.dtype.itemsize

    vmem_cap = _vmem_capacity_bytes()
    vmem_limit = int(vmem_cap * 3 // 4)       # ~48 MiB on v7x, ~96 MiB on v5e/v6e

    slab_bytes = C * HW * itemsize
    w_bytes = sum(int(a.size) * a.dtype.itemsize for a in (w1, b1, w2, b2))

    # ---- Fused single-pass path: one read + one write of x. ---------------
    if (not force_two_pass) and (slab_bytes + w_bytes <= vmem_cap // 8):
        out_flat = pl.pallas_call(
            functools.partial(fused_se_kernel, inv_hw=1.0 / HW),
            out_shape=jax.ShapeDtypeStruct((B, C, HW), x_flat.dtype),
            grid_spec=pltpu.PrefetchScalarGridSpec(
                num_scalar_prefetch=0,
                grid=(B,),
                in_specs=[
                    pl.BlockSpec((1, C, HW), lambda b: (b, 0, 0)),
                    pl.BlockSpec(w1.shape, lambda b: (0, 0)),
                    pl.BlockSpec(b1.shape, lambda b: (0, 0)),
                    pl.BlockSpec(w2.shape, lambda b: (0, 0)),
                    pl.BlockSpec(b2.shape, lambda b: (0, 0)),
                ],
                out_specs=pl.BlockSpec((1, C, HW), lambda b: (b, 0, 0)),
            ),
            compiler_params=pltpu.CompilerParams(
                dimension_semantics=("parallel",),
                vmem_limit_bytes=vmem_limit,
            ),
        )(x_flat, w1, b1, w2, b2)
        return out_flat.reshape(B, C, H, W)

    # ---- Two-pass streaming path. ------------------------------------------
    if tile_hw is None:
        tile_hw = _pick_tile_hw(HW, C, itemsize, vmem_cap)
    tile_hw = max(128, _round_up(int(tile_hw), 128))
    tile_hw = min(tile_hw, _round_up(HW, 128))
    n_tiles = _cdiv(HW, tile_hw)

    # Pass 1: squeeze (spatial sum) -> (B, C, 1) f32, no host padding.
    s_sum = pl.pallas_call(
        functools.partial(pool_sum_kernel, hw=HW, tile_hw=tile_hw),
        out_shape=jax.ShapeDtypeStruct((B, C, 1), jnp.float32),
        grid_spec=pltpu.PrefetchScalarGridSpec(
            num_scalar_prefetch=0,
            grid=(B, n_tiles),
            in_specs=[pl.BlockSpec((1, C, tile_hw), lambda b, k: (b, 0, k))],
            out_specs=pl.BlockSpec((1, C, 1), lambda b, k: (b, 0, 0)),
            scratch_shapes=[pltpu.VMEM((1, C, 128), jnp.float32)],
        ),
        compiler_params=pltpu.CompilerParams(
            dimension_semantics=("parallel", "arbitrary"),
            vmem_limit_bytes=vmem_limit,
        ),
    )(x_flat)

    # Excitation MLP hoisted to plain JAX (a few hundred FLOPs); mean uses the
    # TRUE H*W divisor.
    y = s_sum.reshape(B, C) * (1.0 / HW)
    h = jnp.maximum(y @ w1 + b1, 0.0)
    s = jax.nn.sigmoid(h @ w2 + b2)                            # (B, C)
    s_col = s.reshape(B, C, 1).astype(x_flat.dtype)            # narrow-dtype scale

    # Pass 2: streaming broadcast-multiply straight into the unpadded output.
    out_flat = pl.pallas_call(
        scale_kernel,
        out_shape=jax.ShapeDtypeStruct((B, C, HW), x_flat.dtype),
        grid_spec=pltpu.PrefetchScalarGridSpec(
            num_scalar_prefetch=0,
            grid=(B, n_tiles),
            in_specs=[
                pl.BlockSpec((1, C, tile_hw), lambda b, k: (b, 0, k)),
                pl.BlockSpec((1, C, 1), lambda b, k: (b, 0, 0)),
            ],
            out_specs=pl.BlockSpec((1, C, tile_hw), lambda b, k: (b, 0, k)),
        ),
        compiler_params=pltpu.CompilerParams(
            dimension_semantics=("parallel", "parallel"),
            vmem_limit_bytes=vmem_limit,
        ),
    )(x_flat, s_col)

    return out_flat.reshape(B, C, H, W)


def se_block_ref(x, w1, b1, w2, b2):
    """Plain-JAX reference with the same semantics as the PyTorch module."""
    y = jnp.mean(x, axis=(2, 3))                       # (B, C)
    h = jnp.maximum(y @ w1 + b1, 0.0)
    s = jax.nn.sigmoid(h @ w2 + b2)                    # (B, C)
    return x * s[:, :, None, None]


if __name__ == "__main__":
    # Shapes consistent with SEBlock(channels=32, reduction=16)
    B, C, H, W = 2, 32, 16, 16
    reduction = 16
    hidden = max(1, C // reduction)  # = 2

    key = jax.random.PRNGKey(0)
    kx, kx2, kx3, k1, kb1, k2, kb2 = jax.random.split(key, 7)

    x = jax.random.normal(kx, (B, C, H, W), dtype=jnp.float32)

    # PyTorch nn.Linear stores weight as (out, in); we keep (in, out) so the
    # kernel does y @ W directly (same math, transposed storage).
    w1 = 0.1 * jax.random.normal(k1, (C, hidden), dtype=jnp.float32)
    b1 = 0.1 * jax.random.normal(kb1, (1, hidden), dtype=jnp.float32)
    w2 = 0.1 * jax.random.normal(k2, (hidden, C), dtype=jnp.float32)
    b2 = 0.1 * jax.random.normal(kb2, (1, C), dtype=jnp.float32)

    ref = se_block_ref(x, w1, b1, w2, b2)

    # Test 1: fused single-pass path (slab fits VMEM).
    out1 = jax.block_until_ready(se_block(x, w1, b1, w2, b2))
    assert jnp.allclose(out1, ref, atol=1e-5, rtol=1e-5), "mismatch (fused path)"

    # Test 2: two-pass streaming path with multiple full HW tiles.
    out2 = jax.block_until_ready(
        se_block(x, w1, b1, w2, b2, force_two_pass=True, tile_hw=128))
    assert jnp.allclose(out2, ref, atol=1e-5, rtol=1e-5), "mismatch (two-pass, full tiles)"

    # Test 3: two-pass, HW not a multiple of 128 (single ragged tile + mask).
    x3 = jax.random.normal(kx2, (B, C, 10, 10), dtype=jnp.float32)
    ref3 = se_block_ref(x3, w1, b1, w2, b2)
    out3 = jax.block_until_ready(se_block(x3, w1, b1, w2, b2, force_two_pass=True))
    assert jnp.allclose(out3, ref3, atol=1e-5, rtol=1e-5), "mismatch (two-pass, ragged single tile)"

    # Test 4: two-pass, several tiles with a ragged LAST tile (400 = 3*128 + 16).
    x4 = jax.random.normal(kx3, (B, C, 20, 20), dtype=jnp.float32)
    ref4 = se_block_ref(x4, w1, b1, w2, b2)
    out4 = jax.block_until_ready(
        se_block(x4, w1, b1, w2, b2, force_two_pass=True, tile_hw=128))
    assert jnp.allclose(out4, ref4, atol=1e-5, rtol=1e-5), "mismatch (two-pass, ragged last tile)"

    # Test 5: fused path with HW not a multiple of 128.
    out5 = jax.block_until_ready(se_block(x3, w1, b1, w2, b2))
    assert jnp.allclose(out5, ref3, atol=1e-5, rtol=1e-5), "mismatch (fused, odd HW)"

    print("KERNEL_OK")
</pallas_src>

<mosaic_0001>
module attributes {stable_mosaic.version = 11 : i64} {
  func.func @fused_se_kernel(%arg0: i32, %arg1: memref<1x32x256xf32, #tpu.memory_space<vmem>>, %arg2: memref<32x2xf32, #tpu.memory_space<vmem>>, %arg3: memref<1x2xf32, #tpu.memory_space<vmem>>, %arg4: memref<2x32xf32, #tpu.memory_space<vmem>>, %arg5: memref<1x32xf32, #tpu.memory_space<vmem>>, %arg6: memref<1x32x256xf32, #tpu.memory_space<vmem>>) attributes {dimension_semantics = [#tpu.dimension_semantics<parallel>], iteration_bounds = array<i64: 2>, scalar_prefetch = 0 : i64, scratch_operands = 0 : i64, tpu.core_type = #tpu.core_type<tc>, window_params = [{transform_indices = @transform_0, window_bounds = array<i64: 1, 32, 256>}, {pipeline_mode = #tpu.pipeline_mode<synchronous>, transform_indices = @transform_1, window_bounds = array<i64: 32, 2>}, {pipeline_mode = #tpu.pipeline_mode<synchronous>, transform_indices = @transform_2, window_bounds = array<i64: 1, 2>}, {pipeline_mode = #tpu.pipeline_mode<synchronous>, transform_indices = @transform_3, window_bounds = array<i64: 2, 32>}, {pipeline_mode = #tpu.pipeline_mode<synchronous>, transform_indices = @transform_4, window_bounds = array<i64: 1, 32>}, {transform_indices = @transform_5, window_bounds = array<i64: 1, 32, 256>}]} {
    %c0 = arith.constant 0 : index
    %c0_0 = arith.constant 0 : index
    %c0_1 = arith.constant 0 : index
    %0 = vector.load %arg1[%c0, %c0_0, %c0_1] : memref<1x32x256xf32, #tpu.memory_space<vmem>>, vector<1x32x256xf32>
    %cst = arith.constant dense<0.000000e+00> : vector<1x32xf32>
    %1 = vector.multi_reduction <add>, %0, %cst [2] : vector<1x32x256xf32> to vector<1x32xf32>
    %cst_2 = arith.constant 3.906250e-03 : f32
    %2 = vector.broadcast %cst_2 : f32 to vector<1x32xf32>
    %3 = arith.mulf %1, %2 : vector<1x32xf32>
    %c0_3 = arith.constant 0 : index
    %c0_4 = arith.constant 0 : index
    %4 = vector.load %arg2[%c0_3, %c0_4] : memref<32x2xf32, #tpu.memory_space<vmem>>, vector<32x2xf32>
    %cst_5 = arith.constant dense<0.000000e+00> : vector<1x2xf32>
    %5 = tpu.matmul %3, %4, %cst_5 {dimension_numbers = #tpu.dot_dimension_numbers<[1], [0], [0], [1], [0, 0, 1, 1], [], []>} : vector<1x32xf32>, vector<32x2xf32>, vector<1x2xf32> -> vector<1x2xf32>
    %c0_6 = arith.constant 0 : index
    %c0_7 = arith.constant 0 : index
    %6 = vector.load %arg3[%c0_6, %c0_7] : memref<1x2xf32, #tpu.memory_space<vmem>>, vector<1x2xf32>
    %7 = arith.addf %5, %6 : vector<1x2xf32>
    %cst_8 = arith.constant 0.000000e+00 : f32
    %8 = vector.broadcast %cst_8 : f32 to vector<1x2xf32>
    %9 = arith.maximumf %7, %8 : vector<1x2xf32>
    %c0_9 = arith.constant 0 : index
    %c0_10 = arith.constant 0 : index
    %10 = vector.load %arg4[%c0_9, %c0_10] : memref<2x32xf32, #tpu.memory_space<vmem>>, vector<2x32xf32>
    %cst_11 = arith.constant dense<0.000000e+00> : vector<1x32xf32>
    %11 = tpu.matmul %9, %10, %cst_11 {dimension_numbers = #tpu.dot_dimension_numbers<[1], [0], [0], [1], [0, 0, 1, 1], [], []>} : vector<1x2xf32>, vector<2x32xf32>, vector<1x32xf32> -> vector<1x32xf32>
    %c0_12 = arith.constant 0 : index
    %c0_13 = arith.constant 0 : index
    %12 = vector.load %arg5[%c0_12, %c0_13] : memref<1x32xf32, #tpu.memory_space<vmem>>, vector<1x32xf32>
    %13 = arith.addf %11, %12 : vector<1x32xf32>
    %14 = arith.negf %13 : vector<1x32xf32>
    %15 = math.exp %14 : vector<1x32xf32>
    %cst_14 = arith.constant 1.000000e+00 : f32
    %16 = vector.broadcast %cst_14 : f32 to vector<1x32xf32>
    %17 = arith.addf %16, %15 : vector<1x32xf32>
    %18 = arith.divf %16, %17 : vector<1x32xf32>
    %19 = vector.shape_cast %18 : vector<1x32xf32> to vector<1x32x1xf32>
    %20 = vector.broadcast %19 : vector<1x32x1xf32> to vector<1x32x256xf32>
    %21 = arith.mulf %0, %20 : vector<1x32x256xf32>
    %c0_15 = arith.constant 0 : index
    %c0_16 = arith.constant 0 : index
    %c0_17 = arith.constant 0 : index
    %22 = vector.load %arg6[%c0_15, %c0_16, %c0_17] : memref<1x32x256xf32, #tpu.memory_space<vmem>>, vector<1x32x256xf32>
    tpu.vector_store %arg6[%c0_15, %c0_16, %c0_17], %21 {strides = array<i32>} : memref<1x32x256xf32, #tpu.memory_space<vmem>>, vector<1x32x256xf32>,
    return
  }
  func.func @transform_0(%arg0: i32) -> (i32, i32, i32) {
    %c0_i32 = arith.constant 0 : i32
    %c0_i32_0 = arith.constant 0 : i32
    %c0_i32_1 = arith.constant 0 : i32
    return %arg0, %c0_i32, %c0_i32_0 : i32, i32, i32
  }
  func.func @transform_1(%arg0: i32) -> (i32, i32) {
    %c0_i32 = arith.constant 0 : i32
    %c0_i32_0 = arith.constant 0 : i32
    %c0_i32_1 = arith.constant 0 : i32
    return %c0_i32, %c0_i32_0 : i32, i32
  }
  func.func @transform_2(%arg0: i32) -> (i32, i32) {
    %c0_i32 = arith.constant 0 : i32
    %c0_i32_0 = arith.constant 0 : i32
    %c0_i32_1 = arith.constant 0 : i32
    return %c0_i32, %c0_i32_0 : i32, i32
  }
  func.func @transform_3(%arg0: i32) -> (i32, i32) {
    %c0_i32 = arith.constant 0 : i32
    %c0_i32_0 = arith.constant 0 : i32
    %c0_i32_1 = arith.constant 0 : i32
    return %c0_i32, %c0_i32_0 : i32, i32
  }
  func.func @transform_4(%arg0: i32) -> (i32, i32) {
    %c0_i32 = arith.constant 0 : i32
    %c0_i32_0 = arith.constant 0 : i32
    %c0_i32_1 = arith.constant 0 : i32
    return %c0_i32, %c0_i32_0 : i32, i32
  }
  func.func @transform_5(%arg0: i32) -> (i32, i32, i32) {
    %c0_i32 = arith.constant 0 : i32
    %c0_i32_0 = arith.constant 0 : i32
    %c0_i32_1 = arith.constant 0 : i32
    return %arg0, %c0_i32, %c0_i32_0 : i32, i32, i32
  }
}

</mosaic_0001>

<bundles_post_ra>
// kernel: tpu_custom_call.1
= control target key start
LH: loop header
LB: loop body
LE: loop exit
PB: predicated region body
PF: predicated region fallthrough
CT: control target
= control target key end

     0   :  { %10 = vsyncpa [#allocation3], 0  ;;  %s1027_s0 = inlined_call_operand.hbm [shape: f32[2,32,256], index: 0, kind: input, shape index: {}]   ;;  %s1028_s1 = inlined_call_operand.vmem [shape: f32[32,2], index: 1, kind: input, shape index: {}]   ;;  %s1029_s2 = inlined_call_operand.vmem [shape: f32[1,2], index: 2, kind: input, shape index: {}]   ;;  %s1030_s3 = inlined_call_operand.vmem [shape: f32[2,32], index: 3, kind: input, shape index: {}]   ;;  %s1031_s4 = inlined_call_operand.vmem [shape: f32[1,32], index: 4, kind: input, shape index: {}]   ;;  %s1032_s5 = inlined_call_operand.hbm [shape: f32[2,32,256], index: 5, kind: output, shape index: {}]  }
   0x1   :  { %12 = vsyncpa [#allocation3 + $0x1], 0 }
   0x2   :  { %13 = vsyncpa [#allocation4], 0 }
   0x3   :  { %15 = vsyncpa [#allocation4 + $0x1], 0  ;;  %s816_s18 = smov 0   ;;  %s818_s19 = smov 0  }
   0x4   :  { %s820_s20 = smov 0   ;;  %s822_s21 = smov 0  }
   0x5 LB: > { %s837_s22 = sadd.s32 4294967295, %s776_s21   ;;  %s585_s23 = sadd.s32 4294967294, %s776_s21   ;;  %s776_s21 = sphi %s822_s21, %s1047_s21   ;;  %s772_s20 = sphi %s820_s20, %s1046_s20   ;;  %s768_s19 = sphi %s818_s19, %s1045_s19   ;;  %s764_s18 = sphi %s816_s18, %s1044_s18  }
   0x6   : > { %s841_s24 = sadd.s32 1, %s776_s21   ;;  %s28_s25 = sadd.s32 1, %s772_s20 }
   0x7   : > { %s25_s26 = ssub.s32 %s776_s21, %s841_s24  ;;  %p35_p0 = scmp.ne.s32.totalorder %s772_s20, %s768_s19 }
   0x8   : > { %p26_p1 = scmp.eq.s32.totalorder %s25_s26, 0  ;;  %p36_p2 = scmp.eq.s32.totalorder %s776_s21, 0 }
   0x9   : > { %p41_p3 = scmp.ne.s32.totalorder %s768_s19, %s764_s18  ;;  %p42_p4 = scmp.eq.s32.totalorder %s837_s22, 0 }
   0xa   : > { %s853_s27 = scalar_select %p26_p1, %s772_s20, %s28_s25  }
   0xb   : > { %p855_p5 = por %p36_p2, %p35_p0  ;;  %p859_p6 = por %p42_p4, %p41_p3 }
   0xc   : > { %p149_p7 = scmp.eq.s32.totalorder %s837_s22, 1  ;;  %p155_p8 = scmp.eq.s32.totalorder %s585_s23, 1 }
   0xd   : > { %s1036_s29 = scalar_select %p859_p6, 1, 0 }
   0xe   : > { %p640_p10 = scmp.lt.s32.totalorder %s776_s21, 2  ;;  %p866_p11 = por %p149_p7, %p35_p0 }
   0xf   : > { %p870_p12 = por %p155_p8, %p41_p3  ;;  %s187_s7 = sand.u32 1, %s772_s20  }
  0x10   : > { %s1037_s30 = scalar_select %p866_p11, 1, 0 }
  0x11   : > { %s1038_s6 = scalar_select %p870_p12, 1, 0 }
  0x12   : > { %s603_s8 = sshll.u32 %s776_s21, 10  ;;  %s588_s9 = sshll.u32 %s187_s7, 6 }
  0x13   : > { %s879_s12 = scalar_lea.hbm %s1027_s0, %s603_s8  ;;  %s191_s13 = scalar_lea.vmem [#allocation2], %s588_s9 }
  0x14   : > { %s198_s14 = sshll.u32 %s191_s13, 4  ;;  %p883_p13 = pnand %p640_p10, %p855_p5  ;;  %s887_s14 = int_to_ptr.vmem [resolvable:$true] %s198_s14 }
  0x15   : > { %s889_s16 = scalar_lea.sflag [#allocation3], %s187_s7  ;;  %s684_s17 = scalar_lea.hbm %s879_s12, 1024 }
  0x16   : > { %p685_p0 = scmp.ne.s32.totalorder %s879_s12, %s684_s17  ;;  %p686_p1 = pneg %p883_p13 }
  0x17   : > { %s689_s26 = scalar_lea.hbm %s1027_s0, 2048  ;;  %p690_p4 = scmp.lt.s32.totalorder %s879_s12, %s1027_s0 }
  0x18   : > { %p687_p2 = pnand %p686_p1, %p685_p0  ;;  %p691_p5 = scmp.lt.s32.totalorder %s689_s26, %s684_s17 }
  0x1a   : > { %p688_p3 = pneg %p687_p2  ;;  %p692_p7 = por %p691_p5, %p690_p4 }
  0x1c   : > { %p693_p8 = pnand %p692_p7, %p688_p3 }
  0x1e   : > { %696 = shalt.err (!%p693_p8)
}
  0x1f   : > { %s697_s7 = scalar_lea.vmem %s887_s14, 1024  ;;  %s778_s9 = smov [#allocation2]  }
  0x20   : > { %p698_p10 = scmp.ne.s32.totalorder %s887_s14, %s697_s7  ;;  %s702_s10 = sshll.u32 %s778_s9, 4  ;;  %s703_s10 = int_to_ptr.vmem [resolvable:$false] %s702_s10 }
  0x21   : > { %s704_s11 = scalar_lea.vmem %s703_s10, 2048  ;;  %p705_p2 = scmp.lt.s32.totalorder %s887_s14, %s703_s10 }
  0x22   : > { %p700_p9 = pnand %p698_p10, %p686_p1  ;;  %p706_p12 = scmp.lt.s32.totalorder %s704_s11, %s697_s7 }
  0x24   : > { %p701_p0 = pneg %p700_p9  ;;  %p707_p11 = por %p706_p12, %p705_p2 }
  0x26   : > { %p708_p6 = pnand %p707_p11, %p701_p0 }
  0x28   : > { %711 = shalt.err (!%p708_p6)
}
  0x29   : > { %s779_s13 = smov 256   ;;  %s780_s17 = smov 16  }
  0x2a   : > { %635 = dma.hbm_to_vmem [thread:$0]  (!%p883_p13), %s879_s12, 1024, %s887_s14, %s889_s16, %s779_s13, %s779_s13, %s780_s17  }
  0x2b   : > { %p591_p9 = scmp.ge.s32.totalorder %s776_s21, 1  ;;  %p206_p1 = scmp.lt.s32.totalorder %s776_s21, 3 }
  0x2d   : > { %p207_p3 = pnand %p591_p9, %p206_p1 }
  0x2e   : > { %s913_s23 = sand.u32 (!%p207_p3), 1, %s768_s19   ;;  %p1040_p6 = scmp.ne.s32.totalorder (!%p207_p3), %s1036_s29, 0 }
  0x2f   : > { %210 = sbr.rel (%p207_p3) target bundleno = 770 (0x302), region = 40  ;;  %s592_s25 = sshll.u32 (!%p207_p3), %s913_s23, 6 }
  0x30   : > { %s213_s26 = scalar_lea.sflag (!%p207_p3), [#allocation3], %s913_s23  ;;  %s216_s28 = scalar_lea.vmem (!%p207_p3), [#allocation2], %s592_s25 }
  0x34   : > { %755 = dma.done.wait (%p1040_p6), %s213_s26, 1024  }
  0x35   : > { %757 = vsyncadd (%p1040_p6), %s213_s26, 4294966272  ;;  %v923_v0 = vld [vmem:[%s216_s28] sm:$0xff]  ;;  %v925_v1 = vld [vmem:[%s216_s28 + $0x8] sm:$0xff]  ;;  %v781_v12 = vmov 0.0   ;;  %vm782_vm0 = vmmov 0   ;;  %v276_v17 = vlaneseq  ;;  %vm287_vm1 = vcmask 130112  }
  0x36   : > { %v927_v2 = vld [vmem:[%s216_s28 + $0x20] sm:$0xff]  ;;  %v251_v3 = vadd.f32 %v925_v1, %v923_v0  ;;  %v931_v4 = vld [vmem:[%s216_s28 + $0x28] sm:$0xff]  ;;  %v933_v5 = vld [vmem:[%s216_s28 + $0x10] sm:$0xff]  ;;  %612 = vmatprep.subr.mxu0 %v781_v12  ;;  %623 = vmatprep.subr.mxu1 %v781_v12  ;;  %vm294_vm2 = vcmask 195712   ;;  %vm301_vm3 = vcmask 261312   ;;  %vm303_vm4 = vcmask 261120  }
  0x37   : > { %v935_v6 = vld [vmem:[%s216_s28 + $0x18] sm:$0xff]  ;;  %v257_v7 = vadd.f32 %v931_v4, %v927_v2  ;;  %v939_v8 = vld [vmem:[%s216_s28 + $0x30] sm:$0xff]  ;;  %v268_v15 = vld [vmem:[%s1028_s1 + $0x8] sm:$0xff]  ;;  %620 = vmatprep.mubr.msk.f32.mxu0 %vm782_vm0, %v781_v12  ;;  %625 = vmatprep.mubr.msk.f32.mxu1 %vm782_vm0, %v781_v12  ;;  %v277_v18 = vand.u32 127, %v276_v17  ;;  %v279_v19 = vshrl.u32 %v276_v17, 7  ;;  %vm383_vm5 = vcmask 1041408  }
  0x38   : > { %v941_v9 = vld [vmem:[%s216_s28 + $0x38] sm:$0xff]  ;;  %252 = vadd.xlane.f32.xlu0 %v251_v3  ;;  %v254_v10 = vadd.f32 %v935_v6, %v933_v5  ;;  %v269_v14 = vld [vmem:[%s1028_s1 + $0x10] sm:$0xff]  ;;  %v267_v16 = vld [vmem:[%s1028_s1] sm:$0xff]  ;;  %vm379_vm6 = vcmask 15360   ;;  %s242_s29 = scalar_lea.vmem [#allocation5], %s592_s25  ;;  %s604_s14 = sshll.u32 %s837_s22, 10 }
  0x39   : > { %258 = vadd.xlane.f32.xlu1 %v257_v7  ;;  %v260_v11 = vadd.f32 %v941_v9, %v939_v8  ;;  %v270_v13 = vld [vmem:[%s1028_s1 + $0x18] sm:$0xff]  ;;  %v282_v20 = vadd.s32 4294967288, %v277_v18  ;;  %v289_v22 = vadd.s32 4294967280, %v277_v18  ;;  %v296_v23 = vadd.s32 4294967272, %v277_v18  ;;  %v377_v42 = vld [vmem:[%s1030_s3] sm:$0x3]  ;;  %s982_s16 = scalar_lea.hbm %s1032_s5, %s604_s14 }
  0x3a   : > { %613 = vmatpush3.msra.mxu0 %v270_v13  ;;  %v280_v25 = vsub.s32 %v277_v18, %v279_v19  ;;  %624 = vmatpush3.msk.msra.mxu1 %vm383_vm5, %v377_v42  ;;  %v271_v43 = vld [vmem:[%s1029_s2] sm:$0x1]  ;;  %v465_v55 = vsub.s32 0, %v279_v19  ;;  %s512_s12 = sshll.u32 %s242_s29, 4  ;;  %s499_s22 = scalar_lea.sflag [#allocation4], %s913_s23  ;;  %s977_s12 = int_to_ptr.vmem [resolvable:$true] %s512_s12 }
  0x3b   : > { %614 = vmatprep.subr.mxu0 %v781_v12  ;;  %v285_v27 = vsub.s32 %v282_v20, %v279_v19  ;;  %v292_v28 = vsub.s32 %v289_v22, %v279_v19  ;;  %v299_v31 = vsub.s32 %v296_v23, %v279_v19  ;;  %v378_v48 = vld [vmem:[%s1031_s4] sm:$0x1]  ;;  %s712_s8 = scalar_lea.vmem %s977_s12, 1024  ;;  %p1041_p12 = scmp.ne.s32.totalorder %s1037_s30, 0 }
  0x3c   : > { %255 = vadd.xlane.f32.xlu0 %v254_v10  ;;  %615 = vmatpush3.msra.mxu0 %v269_v14  ;;  %p713_p11 = scmp.ne.s32.totalorder %s977_s12, %s712_s8  ;;  %s783_s7 = smov [#allocation5]  }
  0x3d   : > { %261 = vadd.xlane.f32.xlu1 %v260_v11  ;;  %616 = vmatprep.subr.mxu0 %v781_v12  ;;  %s716_s9 = sshll.u32 %s783_s7, 4  ;;  %s717_s9 = int_to_ptr.vmem [resolvable:$false] %s716_s9 }
  0x3e   : > { %617 = vmatpush3.msra.mxu0 %v268_v15  ;;  %p714_p13 = pnand %p713_p11, %p1041_p12  ;;  %s718_s10 = scalar_lea.vmem %s717_s9, 2048 }
  0x3f   : > { %618 = vmatprep.subr.mxu0 %v781_v12  ;;  %p719_p5 = scmp.lt.s32.totalorder %s977_s12, %s717_s9  ;;  %p720_p7 = scmp.lt.s32.totalorder %s718_s10, %s712_s8 }
  0x40   : > { %619 = vmatpush3.msra.mxu0 %v267_v16  ;;  %p715_p4 = pneg %p714_p13 }
  0x41   : > { %p721_p8 = por %p720_p7, %p719_p5 }
  0x43   : > { %p722_p10 = pnand %p721_p8, %p715_p4 }
  0xc1   : > { %v253_v21 = vpop.xlane.xlu0 %252 }
  0xc2   : > { %v259_v24 = vpop.xlane.xlu1 %258  ;;  %v263_v26 = vmul.f32 0.00390625, %v253_v21 }
  0xc3   : > { %v265_v29 = vmul.f32 0.00390625, %v259_v24 }
  0xc4   : > { %v281_v35 = vrot.slane %v263_v26, %v280_v25 }
  0xc5   : > { %v256_v30 = vpop.xlane.xlu0 %255  ;;  %v293_v37 = vrot.slane %v265_v29, %v292_v28 }
  0xc6   : > { %v264_v32 = vmul.f32 0.00390625, %v256_v30  ;;  %v262_v33 = vpop.xlane.xlu1 %261 }
  0xc7   : > { %v266_v34 = vmul.f32 0.00390625, %v262_v33 }
  0xc8   : > { %v286_v36 = vrot.slane %v264_v32, %v285_v27 }
  0xc9   : > { %v300_v38 = vrot.slane %v266_v34, %v299_v31 }
  0xca   : > { %v288_v39 = vsel %vm287_vm1, %v286_v36, %v281_v35 }
  0xcb   : > { %v295_v40 = vsel %vm294_vm2, %v293_v37, %v288_v39 }
  0xcc   : > { %v302_v41 = vsel %vm301_vm3, %v300_v38, %v295_v40 }
  0xcd   : > { %621 = vmatmul.mubr.msk.f32.vlgmr.msra.gmra.mxu0 %vm303_vm4, %v302_v41 }
 0x18d   : > { %v372_v44 = vpop.f32.mrf.mxu0 }
 0x18e   : > { %v373_v45 = vadd.f32 %v372_v44, %v271_v43 }
 0x18f   : > { %v622_v46 = vpop.f32.mrf.mxu0 }
 0x190   : > { %v376_v47 = vmax.f32 %v373_v45, 0.0 }
 0x192   : > { %626 = vmatmul.mubr.msk.f32.vlgmr.msra.gmra.mxu1 %vm379_vm6, %v376_v47 }
 0x252   : > { %v453_v49 = vpop.f32.mrf.mxu1 }
 0x253   : > { %v454_v50 = vadd.f32 %v453_v49, %v378_v48 }
 0x254   : > { %v627_v51 = vpop.f32.mrf.mxu1 }
 0x255   : > { %v597_v52 = vmul.f32 -1.442695, %v454_v50 }
 0x257   : > { %680 = vpow2.f32 %v597_v52 }
 0x264   : > { %v681_v53 = vpop.eup %680 }
 0x265   : > { %v460_v54 = vadd.f32 1.0, %v681_v53 }
 0x267   : > { %682 = vrcp.f32 %v460_v54 }
 0x274   : > { %v683_v56 = vpop.eup %682 }
 0x275   : > { %v466_v57 = vrot.slane %v683_v56, %v465_v55 }
 0x277   : > { %472 = vbcast.lane.b32.xlu1 %v466_v57, 264  ;;  %468 = vbcast.lane.b32.xlu0 %v466_v57, 256 }
 0x27b   : > { %476 = vbcast.lane.b32.xlu1 %v466_v57, 272 }
 0x27f   : > { %480 = vbcast.lane.b32.xlu1 %v466_v57, 280 }
 0x2e9   : > { %v473_v58 = vpop.permute.xlu1 %472  ;;  %v469_v59 = vpop.permute.xlu0 %468 }
 0x2ea   : > { %v484_v60 = vmul.f32 %v473_v58, %v933_v5  ;;  %v485_v61 = vmul.f32 %v473_v58, %v935_v6  ;;  %v482_v62 = vmul.f32 %v469_v59, %v923_v0  ;;  %v483_v63 = vmul.f32 %v469_v59, %v925_v1 }
 0x2ec   : > { %492 = vst [vmem:[%s242_s29 + $0x10] sm:$0xff] %v484_v60  ;;  %493 = vst [vmem:[%s242_s29 + $0x18] sm:$0xff] %v485_v61 }
 0x2ed   : > { %490 = vst [vmem:[%s242_s29] sm:$0xff] %v482_v62  ;;  %491 = vst [vmem:[%s242_s29 + $0x8] sm:$0xff] %v483_v63  ;;  %v477_v3 = vpop.permute.xlu1 %476 }
 0x2ee   : > { %v486_v7 = vmul.f32 %v477_v3, %v927_v2  ;;  %v487_v5 = vmul.f32 %v477_v3, %v931_v4 }
 0x2f0   : > { %494 = vst [vmem:[%s242_s29 + $0x20] sm:$0xff] %v486_v7  ;;  %495 = vst [vmem:[%s242_s29 + $0x28] sm:$0xff] %v487_v5 }
 0x2f1   : > { %v481_v0 = vpop.permute.xlu1 %480 }
 0x2f2   : > { %v488_v1 = vmul.f32 %v481_v0, %v939_v8  ;;  %v489_v2 = vmul.f32 %v481_v0, %v941_v9 }
 0x2f4   : > { %496 = vst [vmem:[%s242_s29 + $0x30] sm:$0xff] %v488_v1  ;;  %497 = vst [vmem:[%s242_s29 + $0x38] sm:$0xff] %v489_v2 }
 0x2f5   : > { %725 = shalt.err (!%p722_p10)
}
 0x2f6   : > { %s726_s11 = scalar_lea.hbm %s982_s16, 1024  ;;  %s730_s26 = scalar_lea.hbm %s1032_s5, 2048 }
 0x2f7   : > { %p727_p0 = scmp.ne.s32.totalorder %s982_s16, %s726_s11  ;;  %p731_p1 = scmp.lt.s32.totalorder %s982_s16, %s1032_s5 }
 0x2f8   : > { %p732_p3 = scmp.lt.s32.totalorder %s730_s26, %s726_s11 }
 0x2f9   : > { %p728_p2 = pnand %p727_p0, %p1041_p12 }
 0x2fa   : > { %p733_p6 = por %p732_p3, %p731_p1 }
 0x2fb   : > { %p729_p9 = pneg %p728_p2 }
 0x2fd   : > { %p734_p11 = pnand %p733_p6, %p729_p9 }
 0x2ff   : > { %737 = shalt.err (!%p734_p11)
}
 0x300   : > { %s784_s14 = smov 256   ;;  %s785_s25 = smov 16  }
 0x301   : > { %630 = dma.vmem_to_hbm [thread:$0]  (%p1041_p12), %s977_s12, 1024, %s982_s16, %s499_s22, %s784_s14, %s784_s14, %s785_s25  }
 0x302 PF: > { %s527_s15 = sand.u32 1, %s764_s18   ;;  %p1042_p13 = scmp.ne.s32.totalorder %s1038_s6, 0 }
 0x303   : > { %p1043_p4 = scmp.ge.s32.totalorder %s776_s21, 2  ;;  %s528_s8 = scalar_lea.sflag [#allocation4], %s527_s15 }
 0x305   : > { %p637_p5 = pnand %p1043_p4, %p1042_p13 }
 0x307   : > { %p638_p7 = pneg %p637_p5 }
 0x309   : > { %759 = dma.done.wait (%p638_p7), %s528_s8, 1024  }
 0x30a   : > { %761 = vsyncadd (%p638_p7), %s528_s8, 4294966272  ;;  %p18_p8 = scmp.ge.s32.totalorder %s841_s24, 4   ;;  %s1044_s18 = smov %s768_s19 }
 0x30b   : > { %s1045_s19 = smov %s772_s20  ;;  %s1046_s20 = smov %s853_s27 }
 0x30c   : > { %s1047_s21 = smov %s841_s24  ;;  %20 = sbr.rel (!%p18_p8) target bundleno = 5 (0x5), region = 85 }
 0x311   :  { %533 = vsyncpa [#allocation3], 1 }
 0x312   :  { %535 = vsyncpa [#allocation3 + $0x1], 1 }
 0x313   :  { %536 = vsyncpa [#allocation4], 1 }
 0x314   :  { %538 = vsyncpa [#allocation4 + $0x1], 1 }

</bundles_post_ra>
